<compile_context>
chip_gen: v7x
topology: tpu7x:2x2x1
jax: 0.10.0
libtpu: 0.0.40
codegen_flags: <defaults>
</compile_context>

<pallas_src>
import functools

import jax
import jax.numpy as jnp
from jax.experimental import pallas as pl
from jax.experimental.pallas import tpu as pltpu


def _conv3x3_kernel(x_ref, w_ref, b_ref, m_ref, o_ref, *, W):
    """3x3 'same' conv for a block of Bblk images via 9 accumulating MXU matmuls.

    x_ref: (Bblk, Cin, HW + 2*(W+1))  bf16 spatially-flattened, lane-padded input
    w_ref: (Cout, 9*Cin)              bf16 (kh, kw, ci)-ordered weights (resident)
    b_ref: (Cout, 1)                  f32 bias (resident)
    m_ref: (2, HW)                    bf16 {0,1} edge masks (row0: w==0, row1: w==W-1)
    o_ref: (Bblk, Cout, HW)           output; HW lanes (lane-dense, multiple of 128)
    """
    Bblk, Cin, _ = x_ref.shape
    Cout, HW = o_ref.shape[1], o_ref.shape[2]

    # Hoisted once per grid step (not per image / per tap): edge masks broadcast
    # to the tap shape, bias broadcast to the output tile shape.
    m = m_ref[...]                                        # (2, HW) bf16
    left = jnp.broadcast_to(m[0:1, :], (Cin, HW))         # 0 where w == 0
    right = jnp.broadcast_to(m[1:2, :], (Cin, HW))        # 0 where w == W-1
    bias = jnp.broadcast_to(b_ref[...], (Cout, HW))       # f32

    # Unrolled loop over the images of this block: weights stay resident and the
    # fixed per-grid-step cost is amortized over Bblk images.
    for b in range(Bblk):
        x = x_ref[b]                                      # (Cin, Lin) bf16
        acc = bias                                        # f32 accumulator
        for kh in range(3):
            for kw in range(3):
                k = kh * 3 + kw
                off = (W + 1) + (kh - 1) * W + (kw - 1)   # static lane offset
                t = x[:, off:off + HW]                    # (Cin, HW) static slice
                # Horizontal row-wrap fix of the flat layout: cheap mask multiply
                # with a precomputed constant (no iota / compare / select).
                if kw == 0:
                    t = t * left
                elif kw == 2:
                    t = t * right
                # Accumulating matmul (no 9*Cin sublane-concat slab); f32 acc,
                # in-place on v7x's MRB.
                acc = acc + jnp.dot(w_ref[:, k * Cin:(k + 1) * Cin], t,
                                    preferred_element_type=jnp.float32)
        o_ref[b] = acc.astype(o_ref.dtype)


def _pick_batch_block(n):
    """Largest divisor of n that is <= min(8, max(1, n // 2)).

    Amortizes per-grid-step overhead over several images while keeping >= 2 grid
    steps (so both v7x TensorCores get work) whenever n >= 2.
    """
    target = max(1, min(8, n // 2))
    for b in range(target, 0, -1):
        if n % b == 0:
            return b
    return 1


def feature_extraction_pallas(x_nchw, weight_oihw, bias):
    """Forward of FeatureExtraction: Conv2d(Cin, Cout, 3, padding='same').

    x_nchw:      (N, Cin, H, W)  float32
    weight_oihw: (Cout, Cin, 3, 3)
    bias:        (Cout,)
    returns:     (N, Cout, H, W)
    """
    N, Cin, H, W = x_nchw.shape
    Cout = weight_oihw.shape[0]
    HW = H * W
    pad = W + 1
    Lin = HW + 2 * pad

    Bblk = _pick_batch_block(N)
    grid = (N // Bblk,)

    # Layout plumbing (free reshapes, no activation transposes):
    #  - flatten spatial dims row-major and zero-pad W+1 lanes per side so every
    #    3x3 tap is a constant static lane slice inside the kernel;
    #  - bf16 inputs for MXU throughput (accumulation stays f32 in the kernel).
    # TODO(synk): on v5e the standalone pad+cast is an extra HBM pass over the
    # input; folding it into the kernel (or fusing the consumer) would cut traffic.
    x_flat = jnp.pad(x_nchw.reshape(N, Cin, HW).astype(jnp.bfloat16),
                     ((0, 0), (0, 0), (pad, pad)))        # (N, Cin, Lin)
    # OIHW -> O,(kh,kw,ci): matches the tap / weight-slice ordering in the kernel.
    w2 = jnp.transpose(weight_oihw, (0, 2, 3, 1)).reshape(Cout, 9 * Cin)
    w2 = w2.astype(jnp.bfloat16)
    b2 = bias.reshape(Cout, 1).astype(jnp.float32)
    # Precomputed {0,1} horizontal-edge masks (left / right row-wrap), computed
    # once outside the kernel; tiny and resident in VMEM.
    w_pos = jnp.arange(HW, dtype=jnp.int32) % W
    masks = jnp.stack([(w_pos != 0), (w_pos != (W - 1))],
                      axis=0).astype(jnp.bfloat16)        # (2, HW)

    kernel = functools.partial(_conv3x3_kernel, W=W)

    flops = 2 * N * HW * 9 * Cin * Cout
    bytes_accessed = (x_flat.size * 2 + w2.size * 2 + b2.size * 4
                      + masks.size * 2 + N * Cout * HW * 4)

    # Explicit VMEM budget: double-buffered input/output blocks + resident
    # operands + slack for per-tap temporaries; capped so it stays valid on v7x.
    x_blk_bytes = Bblk * Cin * Lin * 2
    o_blk_bytes = Bblk * Cout * HW * 4
    resident_bytes = w2.size * 2 + b2.size * 4 + masks.size * 2
    vmem_limit = int(min(64 * 2 ** 20,
                         max(16 * 2 ** 20,
                             4 * (x_blk_bytes + o_blk_bytes) + 4 * resident_bytes)))

    out_flat = pl.pallas_call(
        kernel,
        out_shape=jax.ShapeDtypeStruct((N, Cout, HW), x_nchw.dtype),
        grid=grid,
        in_specs=[
            pl.BlockSpec((Bblk, Cin, Lin), lambda n: (n, 0, 0)),
            pl.BlockSpec((Cout, 9 * Cin), lambda n: (0, 0)),
            pl.BlockSpec((Cout, 1), lambda n: (0, 0)),
            pl.BlockSpec((2, HW), lambda n: (0, 0)),
        ],
        out_specs=pl.BlockSpec((Bblk, Cout, HW), lambda n: (n, 0, 0)),
        compiler_params=pltpu.CompilerParams(
            dimension_semantics=("parallel",),
            vmem_limit_bytes=vmem_limit),
        cost_estimate=pl.CostEstimate(
            flops=flops, transcendentals=0, bytes_accessed=bytes_accessed),
    )(x_flat, w2, b2, masks)

    # Free reshape back to NCHW (output is channel-major, lane-dense HW).
    return out_flat.reshape(N, Cout, H, W)


if __name__ == "__main__":
    key = jax.random.PRNGKey(0)
    k_x, k_w, k_b = jax.random.split(key, 3)

    # Small shapes; N=4 exercises both the in-kernel batch loop (Bblk=2) and a
    # multi-step parallel grid (2 steps).
    N, Cin, Cout, H, W = 4, 4, 8, 16, 16

    x = jax.random.normal(k_x, (N, Cin, H, W), dtype=jnp.float32)
    # Deterministic synthetic parameters (matching nn.Conv2d(Cin, Cout, 3) shapes).
    weight = jax.random.normal(k_w, (Cout, Cin, 3, 3), dtype=jnp.float32) * 0.1
    bias = jax.random.normal(k_b, (Cout,), dtype=jnp.float32) * 0.1

    out = feature_extraction_pallas(x, weight, bias)
    out = jax.block_until_ready(out)
    assert out.shape == (N, Cout, H, W)

    # Tight check: reference conv with the same bf16-quantized inputs
    # (the kernel accumulates in f32, so this must agree closely).
    x_q = x.astype(jnp.bfloat16).astype(jnp.float32)
    w_q = weight.astype(jnp.bfloat16).astype(jnp.float32)
    ref_q = jax.lax.conv_general_dilated(
        x_q, w_q, window_strides=(1, 1), padding="SAME",
        dimension_numbers=("NCHW", "OIHW", "NCHW")) + bias.reshape(1, Cout, 1, 1)
    assert jnp.allclose(out, ref_q, atol=2e-3, rtol=2e-3)

    # Loose check vs. the full-f32 module semantics (only bf16 input quantization
    # separates the two; accumulation is f32).
    ref = jax.lax.conv_general_dilated(
        x, weight, window_strides=(1, 1), padding="SAME",
        dimension_numbers=("NCHW", "OIHW", "NCHW")) + bias.reshape(1, Cout, 1, 1)
    assert jnp.allclose(out, ref, atol=5e-2, rtol=5e-2)

    print("KERNEL_OK")
</pallas_src>

<mosaic_0001>
module attributes {stable_mosaic.version = 11 : i64} {
  func.func @_conv3x3_kernel(%arg0: i32, %arg1: memref<2x4x290xbf16, #tpu.memory_space<vmem>>, %arg2: memref<8x36xbf16, #tpu.memory_space<vmem>>, %arg3: memref<8x1xf32, #tpu.memory_space<vmem>>, %arg4: memref<2x256xbf16, #tpu.memory_space<vmem>>, %arg5: memref<2x8x256xf32, #tpu.memory_space<vmem>>) attributes {dimension_semantics = [#tpu.dimension_semantics<parallel>], iteration_bounds = array<i64: 2>, scalar_prefetch = 0 : i64, scratch_operands = 0 : i64, tpu.core_type = #tpu.core_type<tc>, window_params = [{transform_indices = @transform_0, window_bounds = array<i64: 2, 4, 290>}, {pipeline_mode = #tpu.pipeline_mode<synchronous>, transform_indices = @transform_1, window_bounds = array<i64: 8, 36>}, {pipeline_mode = #tpu.pipeline_mode<synchronous>, transform_indices = @transform_2, window_bounds = array<i64: 8, 1>}, {pipeline_mode = #tpu.pipeline_mode<synchronous>, transform_indices = @transform_3, window_bounds = array<i64: 2, 256>}, {transform_indices = @transform_4, window_bounds = array<i64: 2, 8, 256>}]} {
    %c0 = arith.constant 0 : index
    %c0_0 = arith.constant 0 : index
    %0 = vector.load %arg4[%c0, %c0_0] : memref<2x256xbf16, #tpu.memory_space<vmem>>, vector<2x256xbf16>
    %1 = vector.extract_strided_slice %0 {offsets = [0, 0], sizes = [1, 256], strides = [1, 1]} : vector<2x256xbf16> to vector<1x256xbf16>
    %2 = vector.shape_cast %1 : vector<1x256xbf16> to vector<1x256xbf16>
    %3 = vector.broadcast %2 : vector<1x256xbf16> to vector<4x256xbf16>
    %4 = vector.extract_strided_slice %0 {offsets = [1, 0], sizes = [1, 256], strides = [1, 1]} : vector<2x256xbf16> to vector<1x256xbf16>
    %5 = vector.shape_cast %4 : vector<1x256xbf16> to vector<1x256xbf16>
    %6 = vector.broadcast %5 : vector<1x256xbf16> to vector<4x256xbf16>
    %c0_1 = arith.constant 0 : index
    %c0_2 = arith.constant 0 : index
    %7 = vector.load %arg3[%c0_1, %c0_2] : memref<8x1xf32, #tpu.memory_space<vmem>>, vector<8x1xf32>
    %8 = vector.shape_cast %7 : vector<8x1xf32> to vector<8x1xf32>
    %9 = vector.broadcast %8 : vector<8x1xf32> to vector<8x256xf32>
    %c0_3 = arith.constant 0 : index
    %c0_4 = arith.constant 0 : index
    %c0_5 = arith.constant 0 : index
    %10 = vector.load %arg1[%c0_3, %c0_4, %c0_5] : memref<2x4x290xbf16, #tpu.memory_space<vmem>>, vector<1x4x290xbf16>
    %11 = vector.shape_cast %10 : vector<1x4x290xbf16> to vector<4x290xbf16>
    %12 = vector.extract_strided_slice %11 {offsets = [0, 0], sizes = [4, 256], strides = [1, 1]} : vector<4x290xbf16> to vector<4x256xbf16>
    %13 = arith.mulf %12, %3 : vector<4x256xbf16>
    %c0_6 = arith.constant 0 : index
    %c0_7 = arith.constant 0 : index
    %14 = vector.load %arg2[%c0_6, %c0_7] : memref<8x36xbf16, #tpu.memory_space<vmem>>, vector<8x4xbf16>
    %cst = arith.constant dense<0.000000e+00> : vector<8x256xf32>
    %15 = tpu.matmul %14, %13, %cst {dimension_numbers = #tpu.dot_dimension_numbers<[1], [0], [0], [1], [0, 0, 1, 1], [], []>} : vector<8x4xbf16>, vector<4x256xbf16>, vector<8x256xf32> -> vector<8x256xf32>
    %16 = arith.addf %9, %15 : vector<8x256xf32>
    %17 = vector.extract_strided_slice %11 {offsets = [0, 1], sizes = [4, 256], strides = [1, 1]} : vector<4x290xbf16> to vector<4x256xbf16>
    %c0_8 = arith.constant 0 : index
    %c4 = arith.constant 4 : index
    %18 = vector.load %arg2[%c0_8, %c4] : memref<8x36xbf16, #tpu.memory_space<vmem>>, vector<8x4xbf16>
    %cst_9 = arith.constant dense<0.000000e+00> : vector<8x256xf32>
    %19 = tpu.matmul %18, %17, %cst_9 {dimension_numbers = #tpu.dot_dimension_numbers<[1], [0], [0], [1], [0, 0, 1, 1], [], []>} : vector<8x4xbf16>, vector<4x256xbf16>, vector<8x256xf32> -> vector<8x256xf32>
    %20 = arith.addf %16, %19 : vector<8x256xf32>
    %21 = vector.extract_strided_slice %11 {offsets = [0, 2], sizes = [4, 256], strides = [1, 1]} : vector<4x290xbf16> to vector<4x256xbf16>
    %22 = arith.mulf %21, %6 : vector<4x256xbf16>
    %c0_10 = arith.constant 0 : index
    %c8 = arith.constant 8 : index
    %23 = vector.load %arg2[%c0_10, %c8] : memref<8x36xbf16, #tpu.memory_space<vmem>>, vector<8x4xbf16>
    %cst_11 = arith.constant dense<0.000000e+00> : vector<8x256xf32>
    %24 = tpu.matmul %23, %22, %cst_11 {dimension_numbers = #tpu.dot_dimension_numbers<[1], [0], [0], [1], [0, 0, 1, 1], [], []>} : vector<8x4xbf16>, vector<4x256xbf16>, vector<8x256xf32> -> vector<8x256xf32>
    %25 = arith.addf %20, %24 : vector<8x256xf32>
    %26 = vector.extract_strided_slice %11 {offsets = [0, 16], sizes = [4, 256], strides = [1, 1]} : vector<4x290xbf16> to vector<4x256xbf16>
    %27 = arith.mulf %26, %3 : vector<4x256xbf16>
    %c0_12 = arith.constant 0 : index
    %c12 = arith.constant 12 : index
    %28 = vector.load %arg2[%c0_12, %c12] : memref<8x36xbf16, #tpu.memory_space<vmem>>, vector<8x4xbf16>
    %cst_13 = arith.constant dense<0.000000e+00> : vector<8x256xf32>
    %29 = tpu.matmul %28, %27, %cst_13 {dimension_numbers = #tpu.dot_dimension_numbers<[1], [0], [0], [1], [0, 0, 1, 1], [], []>} : vector<8x4xbf16>, vector<4x256xbf16>, vector<8x256xf32> -> vector<8x256xf32>
    %30 = arith.addf %25, %29 : vector<8x256xf32>
    %31 = vector.extract_strided_slice %11 {offsets = [0, 17], sizes = [4, 256], strides = [1, 1]} : vector<4x290xbf16> to vector<4x256xbf16>
    %c0_14 = arith.constant 0 : index
    %c16 = arith.constant 16 : index
    %32 = vector.load %arg2[%c0_14, %c16] : memref<8x36xbf16, #tpu.memory_space<vmem>>, vector<8x4xbf16>
    %cst_15 = arith.constant dense<0.000000e+00> : vector<8x256xf32>
    %33 = tpu.matmul %32, %31, %cst_15 {dimension_numbers = #tpu.dot_dimension_numbers<[1], [0], [0], [1], [0, 0, 1, 1], [], []>} : vector<8x4xbf16>, vector<4x256xbf16>, vector<8x256xf32> -> vector<8x256xf32>
    %34 = arith.addf %30, %33 : vector<8x256xf32>
    %35 = vector.extract_strided_slice %11 {offsets = [0, 18], sizes = [4, 256], strides = [1, 1]} : vector<4x290xbf16> to vector<4x256xbf16>
    %36 = arith.mulf %35, %6 : vector<4x256xbf16>
    %c0_16 = arith.constant 0 : index
    %c20 = arith.constant 20 : index
    %37 = vector.load %arg2[%c0_16, %c20] : memref<8x36xbf16, #tpu.memory_space<vmem>>, vector<8x4xbf16>
    %cst_17 = arith.constant dense<0.000000e+00> : vector<8x256xf32>
    %38 = tpu.matmul %37, %36, %cst_17 {dimension_numbers = #tpu.dot_dimension_numbers<[1], [0], [0], [1], [0, 0, 1, 1], [], []>} : vector<8x4xbf16>, vector<4x256xbf16>, vector<8x256xf32> -> vector<8x256xf32>
    %39 = arith.addf %34, %38 : vector<8x256xf32>
    %40 = vector.extract_strided_slice %11 {offsets = [0, 32], sizes = [4, 256], strides = [1, 1]} : vector<4x290xbf16> to vector<4x256xbf16>
    %41 = arith.mulf %40, %3 : vector<4x256xbf16>
    %c0_18 = arith.constant 0 : index
    %c24 = arith.constant 24 : index
    %42 = vector.load %arg2[%c0_18, %c24] : memref<8x36xbf16, #tpu.memory_space<vmem>>, vector<8x4xbf16>
    %cst_19 = arith.constant dense<0.000000e+00> : vector<8x256xf32>
    %43 = tpu.matmul %42, %41, %cst_19 {dimension_numbers = #tpu.dot_dimension_numbers<[1], [0], [0], [1], [0, 0, 1, 1], [], []>} : vector<8x4xbf16>, vector<4x256xbf16>, vector<8x256xf32> -> vector<8x256xf32>
    %44 = arith.addf %39, %43 : vector<8x256xf32>
    %45 = vector.extract_strided_slice %11 {offsets = [0, 33], sizes = [4, 256], strides = [1, 1]} : vector<4x290xbf16> to vector<4x256xbf16>
    %c0_20 = arith.constant 0 : index
    %c28 = arith.constant 28 : index
    %46 = vector.load %arg2[%c0_20, %c28] : memref<8x36xbf16, #tpu.memory_space<vmem>>, vector<8x4xbf16>
    %cst_21 = arith.constant dense<0.000000e+00> : vector<8x256xf32>
    %47 = tpu.matmul %46, %45, %cst_21 {dimension_numbers = #tpu.dot_dimension_numbers<[1], [0], [0], [1], [0, 0, 1, 1], [], []>} : vector<8x4xbf16>, vector<4x256xbf16>, vector<8x256xf32> -> vector<8x256xf32>
    %48 = arith.addf %44, %47 : vector<8x256xf32>
    %49 = vector.extract_strided_slice %11 {offsets = [0, 34], sizes = [4, 256], strides = [1, 1]} : vector<4x290xbf16> to vector<4x256xbf16>
    %50 = arith.mulf %49, %6 : vector<4x256xbf16>
    %c0_22 = arith.constant 0 : index
    %c32 = arith.constant 32 : index
    %51 = vector.load %arg2[%c0_22, %c32] : memref<8x36xbf16, #tpu.memory_space<vmem>>, vector<8x4xbf16>
    %cst_23 = arith.constant dense<0.000000e+00> : vector<8x256xf32>
    %52 = tpu.matmul %51, %50, %cst_23 {dimension_numbers = #tpu.dot_dimension_numbers<[1], [0], [0], [1], [0, 0, 1, 1], [], []>} : vector<8x4xbf16>, vector<4x256xbf16>, vector<8x256xf32> -> vector<8x256xf32>
    %53 = arith.addf %48, %52 : vector<8x256xf32>
    %c0_24 = arith.constant 0 : index
    %c0_25 = arith.constant 0 : index
    %c0_26 = arith.constant 0 : index
    %54 = vector.load %arg5[%c0_24, %c0_25, %c0_26] : memref<2x8x256xf32, #tpu.memory_space<vmem>>, vector<1x8x256xf32>
    %55 = vector.shape_cast %54 : vector<1x8x256xf32> to vector<8x256xf32>
    %56 = vector.shape_cast %53 : vector<8x256xf32> to vector<1x8x256xf32>
    tpu.vector_store %arg5[%c0_24, %c0_25, %c0_26], %56 {strides = array<i32>} : memref<2x8x256xf32, #tpu.memory_space<vmem>>, vector<1x8x256xf32>,
    %c1 = arith.constant 1 : index
    %c0_27 = arith.constant 0 : index
    %c0_28 = arith.constant 0 : index
    %57 = vector.load %arg1[%c1, %c0_27, %c0_28] : memref<2x4x290xbf16, #tpu.memory_space<vmem>>, vector<1x4x290xbf16>
    %58 = vector.shape_cast %57 : vector<1x4x290xbf16> to vector<4x290xbf16>
    %59 = vector.extract_strided_slice %58 {offsets = [0, 0], sizes = [4, 256], strides = [1, 1]} : vector<4x290xbf16> to vector<4x256xbf16>
    %60 = arith.mulf %59, %3 : vector<4x256xbf16>
    %c0_29 = arith.constant 0 : index
    %c0_30 = arith.constant 0 : index
    %61 = vector.load %arg2[%c0_29, %c0_30] : memref<8x36xbf16, #tpu.memory_space<vmem>>, vector<8x4xbf16>
    %cst_31 = arith.constant dense<0.000000e+00> : vector<8x256xf32>
    %62 = tpu.matmul %61, %60, %cst_31 {dimension_numbers = #tpu.dot_dimension_numbers<[1], [0], [0], [1], [0, 0, 1, 1], [], []>} : vector<8x4xbf16>, vector<4x256xbf16>, vector<8x256xf32> -> vector<8x256xf32>
    %63 = arith.addf %9, %62 : vector<8x256xf32>
    %64 = vector.extract_strided_slice %58 {offsets = [0, 1], sizes = [4, 256], strides = [1, 1]} : vector<4x290xbf16> to vector<4x256xbf16>
    %c0_32 = arith.constant 0 : index
    %c4_33 = arith.constant 4 : index
    %65 = vector.load %arg2[%c0_32, %c4_33] : memref<8x36xbf16, #tpu.memory_space<vmem>>, vector<8x4xbf16>
    %cst_34 = arith.constant dense<0.000000e+00> : vector<8x256xf32>
    %66 = tpu.matmul %65, %64, %cst_34 {dimension_numbers = #tpu.dot_dimension_numbers<[1], [0], [0], [1], [0, 0, 1, 1], [], []>} : vector<8x4xbf16>, vector<4x256xbf16>, vector<8x256xf32> -> vector<8x256xf32>
    %67 = arith.addf %63, %66 : vector<8x256xf32>
    %68 = vector.extract_strided_slice %58 {offsets = [0, 2], sizes = [4, 256], strides = [1, 1]} : vector<4x290xbf16> to vector<4x256xbf16>
    %69 = arith.mulf %68, %6 : vector<4x256xbf16>
    %c0_35 = arith.constant 0 : index
    %c8_36 = arith.constant 8 : index
    %70 = vector.load %arg2[%c0_35, %c8_36] : memref<8x36xbf16, #tpu.memory_space<vmem>>, vector<8x4xbf16>
    %cst_37 = arith.constant dense<0.000000e+00> : vector<8x256xf32>
    %71 = tpu.matmul %70, %69, %cst_37 {dimension_numbers = #tpu.dot_dimension_numbers<[1], [0], [0], [1], [0, 0, 1, 1], [], []>} : vector<8x4xbf16>, vector<4x256xbf16>, vector<8x256xf32> -> vector<8x256xf32>
    %72 = arith.addf %67, %71 : vector<8x256xf32>
    %73 = vector.extract_strided_slice %58 {offsets = [0, 16], sizes = [4, 256], strides = [1, 1]} : vector<4x290xbf16> to vector<4x256xbf16>
    %74 = arith.mulf %73, %3 : vector<4x256xbf16>
    %c0_38 = arith.constant 0 : index
    %c12_39 = arith.constant 12 : index
    %75 = vector.load %arg2[%c0_38, %c12_39] : memref<8x36xbf16, #tpu.memory_space<vmem>>, vector<8x4xbf16>
    %cst_40 = arith.constant dense<0.000000e+00> : vector<8x256xf32>
    %76 = tpu.matmul %75, %74, %cst_40 {dimension_numbers = #tpu.dot_dimension_numbers<[1], [0], [0], [1], [0, 0, 1, 1], [], []>} : vector<8x4xbf16>, vector<4x256xbf16>, vector<8x256xf32> -> vector<8x256xf32>
    %77 = arith.addf %72, %76 : vector<8x256xf32>
    %78 = vector.extract_strided_slice %58 {offsets = [0, 17], sizes = [4, 256], strides = [1, 1]} : vector<4x290xbf16> to vector<4x256xbf16>
    %c0_41 = arith.constant 0 : index
    %c16_42 = arith.constant 16 : index
    %79 = vector.load %arg2[%c0_41, %c16_42] : memref<8x36xbf16, #tpu.memory_space<vmem>>, vector<8x4xbf16>
    %cst_43 = arith.constant dense<0.000000e+00> : vector<8x256xf32>
    %80 = tpu.matmul %79, %78, %cst_43 {dimension_numbers = #tpu.dot_dimension_numbers<[1], [0], [0], [1], [0, 0, 1, 1], [], []>} : vector<8x4xbf16>, vector<4x256xbf16>, vector<8x256xf32> -> vector<8x256xf32>
    %81 = arith.addf %77, %80 : vector<8x256xf32>
    %82 = vector.extract_strided_slice %58 {offsets = [0, 18], sizes = [4, 256], strides = [1, 1]} : vector<4x290xbf16> to vector<4x256xbf16>
    %83 = arith.mulf %82, %6 : vector<4x256xbf16>
    %c0_44 = arith.constant 0 : index
    %c20_45 = arith.constant 20 : index
    %84 = vector.load %arg2[%c0_44, %c20_45] : memref<8x36xbf16, #tpu.memory_space<vmem>>, vector<8x4xbf16>
    %cst_46 = arith.constant dense<0.000000e+00> : vector<8x256xf32>
    %85 = tpu.matmul %84, %83, %cst_46 {dimension_numbers = #tpu.dot_dimension_numbers<[1], [0], [0], [1], [0, 0, 1, 1], [], []>} : vector<8x4xbf16>, vector<4x256xbf16>, vector<8x256xf32> -> vector<8x256xf32>
    %86 = arith.addf %81, %85 : vector<8x256xf32>
    %87 = vector.extract_strided_slice %58 {offsets = [0, 32], sizes = [4, 256], strides = [1, 1]} : vector<4x290xbf16> to vector<4x256xbf16>
    %88 = arith.mulf %87, %3 : vector<4x256xbf16>
    %c0_47 = arith.constant 0 : index
    %c24_48 = arith.constant 24 : index
    %89 = vector.load %arg2[%c0_47, %c24_48] : memref<8x36xbf16, #tpu.memory_space<vmem>>, vector<8x4xbf16>
    %cst_49 = arith.constant dense<0.000000e+00> : vector<8x256xf32>
    %90 = tpu.matmul %89, %88, %cst_49 {dimension_numbers = #tpu.dot_dimension_numbers<[1], [0], [0], [1], [0, 0, 1, 1], [], []>} : vector<8x4xbf16>, vector<4x256xbf16>, vector<8x256xf32> -> vector<8x256xf32>
    %91 = arith.addf %86, %90 : vector<8x256xf32>
    %92 = vector.extract_strided_slice %58 {offsets = [0, 33], sizes = [4, 256], strides = [1, 1]} : vector<4x290xbf16> to vector<4x256xbf16>
    %c0_50 = arith.constant 0 : index
    %c28_51 = arith.constant 28 : index
    %93 = vector.load %arg2[%c0_50, %c28_51] : memref<8x36xbf16, #tpu.memory_space<vmem>>, vector<8x4xbf16>
    %cst_52 = arith.constant dense<0.000000e+00> : vector<8x256xf32>
    %94 = tpu.matmul %93, %92, %cst_52 {dimension_numbers = #tpu.dot_dimension_numbers<[1], [0], [0], [1], [0, 0, 1, 1], [], []>} : vector<8x4xbf16>, vector<4x256xbf16>, vector<8x256xf32> -> vector<8x256xf32>
    %95 = arith.addf %91, %94 : vector<8x256xf32>
    %96 = vector.extract_strided_slice %58 {offsets = [0, 34], sizes = [4, 256], strides = [1, 1]} : vector<4x290xbf16> to vector<4x256xbf16>
    %97 = arith.mulf %96, %6 : vector<4x256xbf16>
    %c0_53 = arith.constant 0 : index
    %c32_54 = arith.constant 32 : index
    %98 = vector.load %arg2[%c0_53, %c32_54] : memref<8x36xbf16, #tpu.memory_space<vmem>>, vector<8x4xbf16>
    %cst_55 = arith.constant dense<0.000000e+00> : vector<8x256xf32>
    %99 = tpu.matmul %98, %97, %cst_55 {dimension_numbers = #tpu.dot_dimension_numbers<[1], [0], [0], [1], [0, 0, 1, 1], [], []>} : vector<8x4xbf16>, vector<4x256xbf16>, vector<8x256xf32> -> vector<8x256xf32>
    %100 = arith.addf %95, %99 : vector<8x256xf32>
    %c1_56 = arith.constant 1 : index
    %c0_57 = arith.constant 0 : index
    %c0_58 = arith.constant 0 : index
    %101 = vector.load %arg5[%c1_56, %c0_57, %c0_58] : memref<2x8x256xf32, #tpu.memory_space<vmem>>, vector<1x8x256xf32>
    %102 = vector.shape_cast %101 : vector<1x8x256xf32> to vector<8x256xf32>
    %103 = vector.shape_cast %100 : vector<8x256xf32> to vector<1x8x256xf32>
    tpu.vector_store %arg5[%c1_56, %c0_57, %c0_58], %103 {strides = array<i32>} : memref<2x8x256xf32, #tpu.memory_space<vmem>>, vector<1x8x256xf32>,
    return
  }
  func.func @transform_0(%arg0: i32) -> (i32, i32, i32) {
    %c0_i32 = arith.constant 0 : i32
    %c0_i32_0 = arith.constant 0 : i32
    %c0_i32_1 = arith.constant 0 : i32
    return %arg0, %c0_i32, %c0_i32_0 : i32, i32, i32
  }
  func.func @transform_1(%arg0: i32) -> (i32, i32) {
    %c0_i32 = arith.constant 0 : i32
    %c0_i32_0 = arith.constant 0 : i32
    %c0_i32_1 = arith.constant 0 : i32
    return %c0_i32, %c0_i32_0 : i32, i32
  }
  func.func @transform_2(%arg0: i32) -> (i32, i32) {
    %c0_i32 = arith.constant 0 : i32
    %c0_i32_0 = arith.constant 0 : i32
    %c0_i32_1 = arith.constant 0 : i32
    return %c0_i32, %c0_i32_0 : i32, i32
  }
  func.func @transform_3(%arg0: i32) -> (i32, i32) {
    %c0_i32 = arith.constant 0 : i32
    %c0_i32_0 = arith.constant 0 : i32
    %c0_i32_1 = arith.constant 0 : i32
    return %c0_i32, %c0_i32_0 : i32, i32
  }
  func.func @transform_4(%arg0: i32) -> (i32, i32, i32) {
    %c0_i32 = arith.constant 0 : i32
    %c0_i32_0 = arith.constant 0 : i32
    %c0_i32_1 = arith.constant 0 : i32
    return %arg0, %c0_i32, %c0_i32_0 : i32, i32, i32
  }
}

</mosaic_0001>

<bundles_post_ra>
// kernel: tpu_custom_call.1
= control target key start
LH: loop header
LB: loop body
LE: loop exit
PB: predicated region body
PF: predicated region fallthrough
CT: control target
= control target key end

     0   :  { %9 = vsyncpa [#allocation3], 0  ;;  %s2660_s0 = inlined_call_operand.hbm [shape: bf16[4,4,290], index: 0, kind: input, shape index: {}]   ;;  %s2661_s1 = inlined_call_operand.vmem [shape: bf16[8,36], index: 1, kind: input, shape index: {}]   ;;  %s2662_s2 = inlined_call_operand.vmem [shape: f32[8,1], index: 2, kind: input, shape index: {}]   ;;  %s2663_s3 = inlined_call_operand.vmem [shape: bf16[2,256], index: 3, kind: input, shape index: {}]   ;;  %s2664_s4 = inlined_call_operand.hbm [shape: f32[4,8,256], index: 4, kind: output, shape index: {}]  }
   0x1   :  { %11 = vsyncpa [#allocation3 + $0x1], 0 }
   0x2   :  { %12 = vsyncpa [#allocation4], 0 }
   0x3   :  { %14 = vsyncpa [#allocation4 + $0x1], 0  ;;  %s2215_s15 = smov 0   ;;  %s2217_s16 = smov 0  }
   0x4   :  { %s2219_s17 = smov 0   ;;  %s2221_s18 = smov 0  }
   0x5 LB: > { %s2236_s19 = sadd.s32 4294967295, %s2161_s18   ;;  %s1831_s20 = sadd.s32 4294967294, %s2161_s18   ;;  %s2161_s18 = sphi %s2221_s18, %s2676_s18   ;;  %s2157_s17 = sphi %s2219_s17, %s2675_s17   ;;  %s2153_s16 = sphi %s2217_s16, %s2674_s16   ;;  %s2149_s15 = sphi %s2215_s15, %s2673_s15  }
   0x6   : > { %s2240_s21 = sadd.s32 1, %s2161_s18   ;;  %s27_s22 = sadd.s32 1, %s2157_s17 }
   0x7   : > { %s24_s23 = ssub.s32 %s2161_s18, %s2240_s21  ;;  %p34_p0 = scmp.ne.s32.totalorder %s2157_s17, %s2153_s16 }
   0x8   : > { %p25_p1 = scmp.eq.s32.totalorder %s24_s23, 0  ;;  %p35_p2 = scmp.eq.s32.totalorder %s2161_s18, 0 }
   0x9   : > { %p40_p3 = scmp.ne.s32.totalorder %s2153_s16, %s2149_s15  ;;  %p41_p4 = scmp.eq.s32.totalorder %s2236_s19, 0 }
   0xa   : > { %s2252_s24 = scalar_select %p25_p1, %s2157_s17, %s27_s22  }
   0xb   : > { %p36_p5 = por %p35_p2, %p34_p0  ;;  %p2254_p6 = por %p41_p4, %p40_p3 }
   0xc   : > { %p127_p7 = scmp.eq.s32.totalorder %s2236_s19, 1  ;;  %p133_p8 = scmp.eq.s32.totalorder %s1831_s20, 1 }
   0xd   : > { %p1986_p10 = scmp.lt.s32.totalorder %s2161_s18, 2  ;;  %s162_s28 = sand.u32 1, %s2157_s17  }
   0xe   : > { %p2261_p11 = por %p127_p7, %p34_p0  ;;  %p2265_p12 = por %p133_p8, %p40_p3 }
   0xf   : > { %s1972_s29 = smul.u32 192, %s2161_s18  ;;  %p2276_p13 = pnand %p1986_p10, %p36_p5 }
  0x10   : > { %s2667_s26 = scalar_select %p2261_p11, 1, 0 }
  0x11   : > { %s2668_s27 = scalar_select %p2265_p12, 1, 0 }
  0x12   : > { %s1971_s30 = smul.u32 12, %s162_s28  ;;  %s2274_s7 = scalar_lea.hbm %s2660_s0, %s1972_s29 }
  0x13   : > { %s2282_s11 = scalar_lea.sflag [#allocation3], %s162_s28  ;;  %s2065_s12 = scalar_lea.hbm %s2274_s7, 192 }
  0x14   : > { %s166_s9 = scalar_lea.vmem [#allocation2], %s1971_s30  ;;  %p2066_p0 = scmp.ne.s32.totalorder %s2274_s7, %s2065_s12 }
  0x15   : > { %s174_s10 = sshll.u32 %s166_s9, 4  ;;  %p2067_p1 = pneg %p2276_p13  ;;  %s2280_s10 = int_to_ptr.vmem [resolvable:$true] %s174_s10 }
  0x16   : > { %s2070_s20 = scalar_lea.hbm %s2660_s0, 384  ;;  %p2071_p4 = scmp.lt.u32.totalorder %s2274_s7, %s2660_s0 }
  0x17   : > { %p2068_p2 = pnand %p2067_p1, %p2066_p0  ;;  %p2072_p5 = scmp.lt.u32.totalorder %s2070_s20, %s2065_s12 }
  0x18   : > { %p2074_p8 = scmp.lt.u32.totalorder %s2065_s12, %s2274_s7 }
  0x19   : > { %p2069_p3 = pneg %p2068_p2  ;;  %p2073_p7 = por %p2072_p5, %p2071_p4 }
  0x1b   : > { %p2075_p10 = por %p2074_p8, %p2073_p7 }
  0x1d   : > { %p2076_p9 = pnand %p2075_p10, %p2069_p3 }
  0x1f   : > { %2079 = shalt.err (!%p2076_p9)
}
  0x20   : > { %s2080_s28 = scalar_lea.vmem %s2280_s10, 192  ;;  %s2163_s29 = smov [#allocation2]  }
  0x21   : > { %p2081_p0 = scmp.ne.s32.totalorder %s2280_s10, %s2080_s28  ;;  %s2085_s30 = sshll.u32 %s2163_s29, 4  ;;  %s2086_s30 = int_to_ptr.vmem [resolvable:$false] %s2085_s30 }
  0x22   : > { %s2087_s5 = scalar_lea.vmem %s2086_s30, 384  ;;  %p2088_p11 = scmp.lt.s32.totalorder %s2280_s10, %s2086_s30 }
  0x23   : > { %p2083_p2 = pnand %p2081_p0, %p2067_p1  ;;  %p2089_p4 = scmp.lt.s32.totalorder %s2087_s5, %s2080_s28 }
  0x25   : > { %p2084_p12 = pneg %p2083_p2  ;;  %p2090_p5 = por %p2089_p4, %p2088_p11 }
  0x27   : > { %p2091_p7 = pnand %p2090_p5, %p2084_p12 }
  0x29   : > { %2094 = shalt.err (!%p2091_p7)
}
  0x2a   : > { %s2164_s6 = smov 96   ;;  %s2165_s9 = smov 6  }
  0x2b   : > { %1981 = dma.hbm_to_vmem [thread:$0]  (!%p2276_p13), %s2274_s7, 192, %s2280_s10, %s2282_s11, %s2164_s6, %s2164_s6, %s2165_s9  }
  0x2c   : > { %p1837_p9 = scmp.ge.s32.totalorder %s2161_s18, 1  ;;  %p182_p1 = scmp.lt.s32.totalorder %s2161_s18, 3 }
  0x2e   : > { %p183_p3 = pnand %p1837_p9, %p182_p1 }
  0x2f   : > { %s2313_s12 = sand.u32 (!%p183_p3), 1, %s2153_s16  }
  0x30   : > { %186 = sbr.rel (%p183_p3) target bundleno = 643 (0x283), region = 36  ;;  %s189_s14 = scalar_lea.sflag (!%p183_p3), [#allocation3], %s2313_s12 }
  0x31   : > { %s1973_s13 = smul.u32 (!%p183_p3), 12, %s2313_s12 }
  0x33   : > { %s2317_s20 = scalar_lea.vmem (!%p183_p3), [#allocation2], %s1973_s13 }
  0x37   : > { %2140 = dma.done.wait (%p2254_p6), %s189_s14, 192  }
  0x38   : > { %2142 = vsyncadd (%p2254_p6), %s189_s14, 4294967104  ;;  %v233_v0 = vlaneseq  ;;  %v2166_v1 = vmov 1966171168   ;;  %v2167_v6 = vmov 1983009808   ;;  %s2168_s25 = smov 32  }
  0x39   : > { %v231_v2 = vunpack.c.l.s4 %v2166_v1  ;;  %v283_v7 = vunpack.c.l.s4 %v2167_v6  ;;  %v1839_v8 = vld.sshfl [vmem:[%s2663_s3] sm:$0x11 pattern:$0x75316420]  ;;  %v2342_v32 = vld [vmem:[%s2317_s20 + $0x6] sm:$0x3f] }
  0x3a   : > { %v234_v3 = vshrl.u32 %v233_v0, 7  ;;  %v229_v9 = vcombine.high %v1839_v8, %v1839_v8  ;;  %v2327_v20 = vld [vmem:[%s2317_s20] sm:$0x3f]  ;;  %s2169_s10 = smov 2   ;;  %s2170_s11 = smov 127   ;;  %v1112_v35 = vcombine.high %v2342_v32, %v2342_v32  ;;  %vm305_vm0 = vcmask 1041408  }
  0x3b   : > { %v232_v4 = vunpack.c.0.s8 %v231_v2  ;;  %v284_v11 = vunpack.c.0.s8 %v283_v7  ;;  %s2171_s22 = smov 16   ;;  %v362_v38 = vcombine.high %v2327_v20, %v2327_v20  ;;  %v2172_v45 = vmov 0   ;;  %v2049_v47 = vld [vmem:[%s2661_s1] ss:$0 sps:$4 sm:$0xff]   ;;  %s2173_s9 = smov 124  }
  0x3c   : > { %v249_v13 = vsub.s32 0, %v234_v3  ;;  %1094 = vmatprep.mubr.bf16.mxu1 %v2172_v45  ;;  %vm301_vm1 = vcmask 31744   ;;  %v1043_v48 = vld [vmem:[%s2661_s1] sm:$0xf]  ;;  %344 = vmatprep.mubr.bf16.mxu0 %v2172_v45  ;;  %s2174_s20 = smov 18   ;;  %s2176_s28 = smov 120  }
  0x3d   : > { %v235_v5 = vsub.s32 %v232_v4, %v234_v3  ;;  %v2329_v23 = vsub.s32 %v284_v11, %v234_v3  ;;  %v291_v49 = vld [vmem:[%s2661_s1] sm:$0xf]  ;;  %2045 = vset.pattern.permute.xlu1 %v2172_v45  ;;  %2046 = vset.pattern.permute.xlu0 %v2172_v45  ;;  %s2177_s30 = smov 116   ;;  %vm452_vm2 = vcmask 15360   ;;  %vm543_vm3 = vcmask 130048   ;;  %s2179_s13 = smov 112  }
  0x3e   : > { %v2050_v51 = vld [vmem:[%s2661_s1] ss:$0 sps:$4 sm:$0xff]   ;;  %vm384_vm4 = vcmask 1039360   ;;  %s2180_s14 = smov 126   ;;  %vm701_vm5 = vcmask 146432   ;;  %vm792_vm6 = vcmask 261120  }
  0x3f   : > { %v236_v10 = vrot.slane %v1839_v8, %v235_v5  ;;  %v243_v12 = vrot.slane %v229_v9, %v235_v5  ;;  %v2333_v27 = vrot.slane %v2327_v20, %v2329_v23  ;;  %v2349_v34 = vrot.slane %v2342_v32, %v2329_v23  ;;  %v2051_v52 = vld [vmem:[%s2661_s1] ss:$0 sps:$4 sm:$0xff]   ;;  %s2183_s5 = smov 96   ;;  %s2185_s7 = smov 95  }
  0x40   : > { %v2362_v41 = vrot.slane %v1112_v35, %v2329_v23  ;;  %v2371_v46 = vrot.slane %v362_v38, %v2329_v23  ;;  %v2053_v53 = vld [vmem:[%s2661_s1] ss:$0 sps:$4 sm:$0xff]   ;;  %vm950_vm7 = vcmask 277504   ;;  %vm485_vm8 = vcmask 1031168   ;;  %s1902_s8 = sshll.u32 %s2236_s19, 9  ;;  %s1744_s23 = scalar_lea.sflag [#allocation4], %s2313_s12 }
  0x41   : > { %v258_v14 = vshrl.u32 %v236_v10, 16  ;;  %v245_v15 = vpack.i.b16 %v236_v10, %v236_v10  ;;  %v265_v17 = vshrl.u32 %v243_v12, 16  ;;  %v252_v19 = vpack.i.b16 %v243_v12, %v243_v12  ;;  %v2052_v54 = vld [vmem:[%s2661_s1] ss:$0 sps:$4 sm:$0xff]   ;;  %p2670_p11 = scmp.ne.s32.totalorder %s2667_s26, 0 }
  0x42   : > { %v2339_v31 = vcombine.high %v2333_v27, %v2333_v27  ;;  %v2392_v50 = vcombine.high %v2349_v34, %v2349_v34  ;;  %v2054_v55 = vld [vmem:[%s2661_s1] ss:$0 sps:$4 sm:$0xff]   ;;  %vm576_vm9 = vcmask 916480   ;;  %vm643_vm10 = vcmask 908288  }
  0x43   : > { %v259_v16 = vpack.i.b16 %v258_v14, %v258_v14  ;;  %v250_v18 = vrot.slane %v245_v15, %v249_v13  ;;  %v266_v22 = vpack.i.b16 %v265_v17, %v265_v17  ;;  %v257_v24 = vrot.slane %v252_v19, %v249_v13 }
  0x44   : > { %vm734_vm11 = vcmask 900096   ;;  %vm825_vm12 = vcmask 785408   ;;  %vm892_vm13 = vcmask 777216   ;;  %vm983_vm14 = vcmask 769024  }
  0x45   : > { %v264_v21 = vrot.slane %v259_v16, %v249_v13  ;;  %v271_v25 = vrot.slane %v266_v22, %v249_v13  ;;  %v281_v26 = vcombine.low %v250_v18, %v257_v24 }
  0x47   : > { %v441_v28 = vcombine.low %v264_v21, %v271_v25  ;;  %v288_v29 = vrot.slane %v281_v26, %v2329_v23 }
  0x49   : > { %v448_v30 = vrot.slane %v441_v28, %v2329_v23  ;;  %789 = vrot.lane.b32.xlu1 %v288_v29, %s2168_s25  ;;  %v1042_v33 = vmul.bf16 %v2342_v32, %v288_v29  ;;  %v290_v36 = vmul.bf16 %v288_v29, %v2327_v20  ;;  %s2175_s25 = smov 34  }
  0x4b   : > { %449 = vrot.lane.b32.xlu0 %v448_v30, %s2169_s10  ;;  %v1051_v37 = vrot.slane %v1042_v33, %v2329_v23  ;;  %v299_v39 = vrot.slane %v290_v36, %v2329_v23  ;;  %s2181_s10 = smov 110  }
  0x4d   : > { %380 = vrot.lane.b32.xlu1 %v2339_v31, %s2170_s11  ;;  %v1052_v40 = vcombine.high %v1051_v37, %v1051_v37  ;;  %v300_v42 = vcombine.high %v299_v39, %v299_v39  ;;  %v1057_v43 = vsel %vm305_vm0, %v1051_v37, 0  ;;  %v307_v44 = vsel %vm305_vm0, %v299_v39, 0 }
  0x4f   : > { %540 = vrot.lane.b32.xlu0 %v288_v29, %s2171_s22  ;;  %1867 = vmatprep.subr.msk.bf16.mxu1 %vm305_vm0, %v1052_v40 }
  0x50   : > { %1840 = vmatprep.subr.msk.bf16.mxu0 %vm305_vm0, %v300_v42  ;;  %1063 = vmatpush1.bf16.msra.mxu1 %v1057_v43 }
  0x51   : > { %1128 = vrot.lane.b32.xlu1 %v2349_v34, %s2170_s11  ;;  %313 = vmatpush1.bf16.msra.mxu0 %v307_v44  ;;  %v2055_v44 = vld [vmem:[%s2661_s1] ss:$0 sps:$4 sm:$0xff]  }
  0x53   : > { %378 = vrot.lane.b32.xlu0 %v2333_v27, %s2170_s11  ;;  %1868 = vmatmul.mubr.msk.bf16.vlgmr.msra.gmra.mrb[0].mxu1 %vm301_vm1, %v1043_v48 }
  0x54   : > { %1841 = vmatmul.mubr.msk.bf16.vlgmr.msra.gmra.mrb[0].mxu0 %vm301_vm1, %v291_v49  ;;  %1177 = vmatprep.mubr.bf16.mxu1 %v2172_v45 }
  0x55   : > { %1132 = vrot.lane.b32.xlu1 %v2362_v41, %s2170_s11  ;;  %428 = vmatprep.mubr.bf16.mxu0 %v2172_v45 }
  0x57   : > { %382 = vrot.lane.b32.xlu0 %v2371_v46, %s2170_s11 }
  0x59   : > { %1109 = vrot.lane.b32.xlu1 %v2049_v47, %s2173_s9  ;;  %v2056_v47 = vld [vmem:[%s2661_s1] ss:$0 sps:$4 sm:$0xff]  }
  0x5b   : > { %1130 = vrot.lane.b32.xlu0 %v2392_v50, %s2170_s11  ;;  %s2187_s11 = smov 94  }
  0x5d   : > { %698 = vrot.lane.b32.xlu1 %v448_v30, %s2174_s20  ;;  %s2184_s20 = smov 104  }
  0x5f   : > { %359 = vrot.lane.b32.xlu0 %v2050_v51, %s2173_s9  ;;  %s2178_s9 = smov 111  }
  0x61   : > { %947 = vrot.lane.b32.xlu1 %v448_v30, %s2175_s25 }
  0x63   : > { %460 = vrot.lane.b32.xlu0 %v2051_v52, %s2176_s28 }
  0x65   : > { %551 = vrot.lane.b32.xlu1 %v2053_v53, %s2177_s30 }
  0x67   : > { %1193 = vrot.lane.b32.xlu0 %v2052_v54, %s2176_s28  ;;  %s2186_s28 = smov 100  }
  0x69   : > { %637 = vrot.lane.b32.xlu1 %v2333_v27, %s2178_s9 }
  0x6b   : > { %1277 = vrot.lane.b32.xlu0 %v2054_v55, %s2177_s30  ;;  %v2057_v55 = vld [vmem:[%s2661_s1] ss:$0 sps:$4 sm:$0xff]   ;;  %s2182_s30 = smov 108  }
  0x6f   : > { %639 = vrot.lane.b32.xlu0 %v2339_v31, %s2178_s9 }
  0xbb   : > { %v2419_v56 = vpop.permute.xlu1 %789 }
  0xbc   : > { %v791_v42 = vrot.slane %v2419_v56, 6 }
  0xbd   : > { %v450_v57 = vpop.permute.xlu0 %449 }
  0xbe   : > { %v451_v59 = vrot.slane %v450_v57, 6  ;;  %v793_v51 = vsel %vm792_vm6, %v791_v42, %v2419_v56  ;;  %v2058_v56 = vld [vmem:[%s2661_s1] ss:$0 sps:$4 sm:$0xff]  }
  0xbf   : > { %v381_v58 = vpop.permute.xlu1 %380  ;;  %v795_v52 = vmul.bf16 %v793_v51, %v2327_v20 }
  0xc0   : > { %v453_v62 = vsel %vm452_vm2, %v451_v59, %v450_v57  ;;  %v1506_v59 = vmul.bf16 %v2342_v32, %v793_v51 }
  0xc1   : > { %v541_v60 = vpop.permute.xlu0 %540  ;;  %v455_v5 = vmul.bf16 %v453_v62, %v2327_v20  ;;  %v1188_v6 = vmul.bf16 %v2342_v32, %v453_v62  ;;  %v810_v57 = vrot.slane %v795_v52, %v2329_v23 }
  0xc2   : > { %v542_v61 = vrot.slane %v541_v60, 6  ;;  %v1521_v62 = vrot.slane %v1506_v59, %v2329_v23 }
  0xc3   : > { %v1129_v3 = vpop.permute.xlu1 %1128  ;;  %v470_v13 = vrot.slane %v455_v5, %v2329_v23  ;;  %v1203_v14 = vrot.slane %v1188_v6, %v2329_v23  ;;  %v463_v28 = vcombine.high %v455_v5, %v455_v5  ;;  %v1196_v33 = vcombine.high %v1188_v6, %v1188_v6 }
  0xc4   : > { %v544_v63 = vsel %vm543_vm3, %v542_v61, %v541_v60  ;;  %v818_v60 = vcombine.high %v810_v57, %v810_v57 }
  0xc5   : > { %v546_v0 = vmul.bf16 %v544_v63, %v2327_v20  ;;  %v1272_v1 = vmul.bf16 %v2342_v32, %v544_v63  ;;  %v379_v2 = vpop.permute.xlu0 %378  ;;  %v477_v35 = vrot.slane %v463_v28, %v2329_v23  ;;  %v478_v36 = vcombine.high %v470_v13, %v470_v13 }
  0xc6   : > { %v385_v4 = vsel %vm384_vm4, %v379_v2, %v381_v58  ;;  %v1211_v37 = vcombine.high %v1203_v14, %v1203_v14  ;;  %v1210_v38 = vrot.slane %v1196_v33, %v2329_v23 }
  0xc7   : > { %v1287_v7 = vrot.slane %v1272_v1, %v2329_v23  ;;  %v561_v8 = vrot.slane %v546_v0, %v2329_v23  ;;  %v391_v9 = vsel %vm305_vm0, %v385_v4, 0  ;;  %v554_v12 = vcombine.high %v546_v0, %v546_v0  ;;  %v1133_v15 = vpop.permute.xlu1 %1132 }
  0xc8   : > { %v1280_v19 = vcombine.high %v1272_v1, %v1272_v1 }
  0xc9   : > { %1296 = vrot.lane.b32.xlu0 %v1287_v7, %s2179_s13  ;;  %570 = vrot.lane.b32.xlu1 %v561_v8, %s2179_s13  ;;  %v383_v10 = vpop.permute.xlu0 %382  ;;  %v569_v21 = vcombine.high %v561_v8, %v561_v8  ;;  %v568_v22 = vrot.slane %v554_v12, %v2329_v23  ;;  %v1295_v30 = vcombine.high %v1287_v7, %v1287_v7  ;;  %v2059_v8 = vld [vmem:[%s2661_s1] ss:$0 sps:$4 sm:$0xff]  }
  0xca   : > { %v386_v11 = vsel %vm384_vm4, %v381_v58, %v383_v10  ;;  %v1294_v29 = vrot.slane %v1280_v19, %v2329_v23  ;;  %v803_v58 = vcombine.high %v795_v52, %v795_v52  ;;  %v1529_v7 = vcombine.high %v1521_v62, %v1521_v62  ;;  %v2064_v19 = vld [vmem:[%s2661_s1] ss:$0 sps:$4 sm:$0xff]  }
  0xcb   : > { %1843 = vmatprep.subr.msk.bf16.mxu0 %vm305_vm0, %v386_v11  ;;  %v1110_v26 = vpop.permute.xlu1 %1109 }
  0xcc   : > { %397 = vmatpush1.bf16.msra.mxu0 %v391_v9  ;;  %v817_v63 = vrot.slane %v803_v58, %v2329_v23  ;;  %v2060_v9 = vld [vmem:[%s2661_s1] ss:$0 sps:$4 sm:$0xff]  }
  0xcd   : > { %479 = vrot.lane.b32.xlu0 %v470_v13, %s2180_s14  ;;  %1212 = vrot.lane.b32.xlu1 %v1203_v14, %s2180_s14  ;;  %v1131_v16 = vpop.permute.xlu0 %1130  ;;  %v2061_v13 = vld [vmem:[%s2661_s1] ss:$0 sps:$4 sm:$0xff]  }
  0xce   : > { %v1134_v17 = vsel %vm384_vm4, %v1129_v3, %v1131_v16  ;;  %v1135_v18 = vsel %vm384_vm4, %v1131_v16, %v1133_v15  ;;  %v1514_v3 = vcombine.high %v1506_v59, %v1506_v59 }
  0xcf   : > { %v1140_v24 = vsel %vm305_vm0, %v1134_v17, 0  ;;  %1870 = vmatprep.subr.msk.bf16.mxu1 %vm305_vm0, %v1135_v18  ;;  %v699_v39 = vpop.permute.xlu1 %698  ;;  %v2063_v18 = vld [vmem:[%s2661_s1] ss:$0 sps:$4 sm:$0xff]  }
  0xd0   : > { %1146 = vmatpush1.bf16.msra.mxu1 %v1140_v24  ;;  %v700_v40 = vrot.slane %v699_v39, 6  ;;  %v1528_v6 = vrot.slane %v1514_v3, %v2329_v23 }
  0xd1   : > { %572 = vrot.lane.b32.xlu0 %v569_v21, %s2179_s13  ;;  %574 = vrot.lane.b32.xlu1 %v568_v22, %s2179_s13  ;;  %v360_v25 = vpop.permute.xlu0 %359 }
  0xd2   : > { %1844 = vmatmul.mubr.msk.bf16.vlgmr.msra.gmra.mrb[0].mxu0 %vm301_vm1, %v360_v25  ;;  %v702_v43 = vsel %vm701_vm5, %v700_v40, %v699_v39 }
  0xd3   : > { %1871 = vmatmul.mubr.msk.bf16.vlgmr.msra.gmra.mrb[0].mxu1 %vm301_vm1, %v1110_v26  ;;  %529 = vmatprep.mubr.bf16.mxu0 %v2172_v45  ;;  %v704_v48 = vmul.bf16 %v702_v43, %v2327_v20  ;;  %v1422_v49 = vmul.bf16 %v2342_v32, %v702_v43  ;;  %v948_v10 = vpop.permute.xlu1 %947 }
  0xd4   : > { %1261 = vmatprep.mubr.bf16.mxu1 %v2172_v45  ;;  %v949_v11 = vrot.slane %v948_v10, 6 }
  0xd5   : > { %1300 = vrot.lane.b32.xlu0 %v1294_v29, %s2179_s13  ;;  %1298 = vrot.lane.b32.xlu1 %v1295_v30, %s2179_s13  ;;  %v1437_v53 = vrot.slane %v1422_v49, %v2329_v23  ;;  %v719_v54 = vrot.slane %v704_v48, %v2329_v23  ;;  %v712_v61 = vcombine.high %v704_v48, %v704_v48  ;;  %v461_v17 = vpop.permute.xlu0 %460 }
  0xd6   : > { %v1430_v0 = vcombine.high %v1422_v49, %v1422_v49  ;;  %v951_v12 = vsel %vm950_vm7, %v949_v11, %v948_v10 }
  0xd7   : > { %v727_v1 = vcombine.high %v719_v54, %v719_v54  ;;  %v726_v2 = vrot.slane %v712_v61, %v2329_v23  ;;  %v1445_v5 = vcombine.high %v1437_v53, %v1437_v53  ;;  %v552_v22 = vpop.permute.xlu1 %551 }
  0xd8   : > { %v1444_v4 = vrot.slane %v1430_v0, %v2329_v23 }
  0xd9   : > { %483 = vrot.lane.b32.xlu0 %v477_v35, %s2180_s14  ;;  %481 = vrot.lane.b32.xlu1 %v478_v36, %s2180_s14  ;;  %v1194_v21 = vpop.permute.xlu0 %1193 }
  0xdb   : > { %v638_v25 = vpop.permute.xlu1 %637 }
  0xdd   : > { %1214 = vrot.lane.b32.xlu0 %v1211_v37, %s2180_s14  ;;  %1216 = vrot.lane.b32.xlu1 %v1210_v38, %s2180_s14  ;;  %v1278_v24 = vpop.permute.xlu0 %1277 }
  0xe1   : > { %1362 = vrot.lane.b32.xlu0 %v2349_v34, %s2178_s9  ;;  %641 = vrot.lane.b32.xlu1 %v2371_v46, %s2178_s9  ;;  %v640_v26 = vpop.permute.xlu0 %639 }
  0xe5   : > { %1366 = vrot.lane.b32.xlu0 %v2362_v41, %s2178_s9  ;;  %1364 = vrot.lane.b32.xlu1 %v2392_v50, %s2178_s9 }
  0xe9   : > { %1360 = vrot.lane.b32.xlu0 %v2055_v44, %s2179_s13  ;;  %635 = vrot.lane.b32.xlu1 %v2056_v47, %s2179_s13 }
  0xed   : > { %1446 = vrot.lane.b32.xlu0 %v1437_v53, %s2181_s10  ;;  %728 = vrot.lane.b32.xlu1 %v719_v54, %s2181_s10 }
  0xf1   : > { %1427 = vrot.lane.b32.xlu0 %v2057_v55, %s2182_s30  ;;  %709 = vrot.lane.b32.xlu1 %v2058_v56, %s2182_s30 }
  0xf5   : > { %821 = vrot.lane.b32.xlu0 %v818_v60, %s2183_s5  ;;  %819 = vrot.lane.b32.xlu1 %v810_v57, %s2183_s5 }
  0xf9   : > { %1530 = vrot.lane.b32.xlu0 %v1521_v62, %s2183_s5  ;;  %823 = vrot.lane.b32.xlu1 %v817_v63, %s2183_s5 }
  0xfd   : > { %730 = vrot.lane.b32.xlu0 %v727_v1, %s2181_s10  ;;  %732 = vrot.lane.b32.xlu1 %v726_v2, %s2181_s10  ;;  %v644_v1 = vsel %vm643_vm10, %v638_v25, %v640_v26 }
 0x101   : > { %1450 = vrot.lane.b32.xlu0 %v1444_v4, %s2181_s10  ;;  %1448 = vrot.lane.b32.xlu1 %v1445_v5, %s2181_s10  ;;  %v650_v4 = vsel %vm305_vm0, %v644_v1, 0  ;;  %s2615_s10 = scalar_lea.hbm %s2664_s4, %s1902_s8 }
 0x105   : > { %1534 = vrot.lane.b32.xlu0 %v1528_v6, %s2183_s5  ;;  %1532 = vrot.lane.b32.xlu1 %v1529_v7, %s2183_s5 }
 0x109   : > { %1511 = vrot.lane.b32.xlu0 %v2059_v8, %s2184_s20  ;;  %800 = vrot.lane.b32.xlu1 %v2060_v9, %s2184_s20 }
 0x10d   : > { %888 = vrot.lane.b32.xlu0 %v2339_v31, %s2185_s7  ;;  %886 = vrot.lane.b32.xlu1 %v2333_v27, %s2185_s7  ;;  %v2062_v27 = vld [vmem:[%s2661_s1] ss:$0 sps:$4 sm:$0xff]   ;;  %v953_v31 = vmul.bf16 %v951_v12, %v2327_v20 }
 0x111   : > { %1596 = vrot.lane.b32.xlu0 %v2349_v34, %s2185_s7  ;;  %890 = vrot.lane.b32.xlu1 %v2371_v46, %s2185_s7  ;;  %v1656_v34 = vmul.bf16 %v2342_v32, %v951_v12  ;;  %v961_v46 = vcombine.high %v953_v31, %v953_v31 }
 0x113   : > { %v1664_v14 = vcombine.high %v1656_v34, %v1656_v34  ;;  %v975_v16 = vrot.slane %v961_v46, %v2329_v23 }
 0x115   : > { %1600 = vrot.lane.b32.xlu0 %v2362_v41, %s2185_s7  ;;  %1598 = vrot.lane.b32.xlu1 %v2392_v50, %s2185_s7  ;;  %v1671_v41 = vrot.slane %v1656_v34, %v2329_v23  ;;  %v968_v50 = vrot.slane %v953_v31, %v2329_v23  ;;  %v1678_v20 = vrot.slane %v1664_v14, %v2329_v23  ;;  %v272_v23 = vld [vmem:[%s2662_s2] sm:$0xff] }
 0x117   : > { %v976_v15 = vcombine.high %v968_v50, %v968_v50  ;;  %v1679_v32 = vcombine.high %v1671_v41, %v1671_v41 }
 0x119   : > { %1594 = vrot.lane.b32.xlu0 %v2061_v13, %s2186_s28  ;;  %884 = vrot.lane.b32.xlu1 %v2062_v27, %s2186_s28 }
 0x11d   : > { %1680 = vrot.lane.b32.xlu0 %v1671_v41, %s2187_s11  ;;  %977 = vrot.lane.b32.xlu1 %v968_v50, %s2187_s11 }
 0x121   : > { %979 = vrot.lane.b32.xlu0 %v976_v15, %s2187_s11  ;;  %981 = vrot.lane.b32.xlu1 %v975_v16, %s2187_s11 }
 0x125   : > { %1684 = vrot.lane.b32.xlu0 %v1678_v20, %s2187_s11  ;;  %1682 = vrot.lane.b32.xlu1 %v1679_v32, %s2187_s11  ;;  %s2188_s11 = smov [#allocation5]  }
 0x126   : > { %s2099_s29 = sshll.u32 %s2188_s11, 4  ;;  %s2100_s29 = int_to_ptr.vmem [resolvable:$false] %s2099_s29 }
 0x127   : > { %s2101_s30 = scalar_lea.vmem %s2100_s29, 1024 }
 0x129   : > { %958 = vrot.lane.b32.xlu1 %v2063_v18, %s2183_s5  ;;  %1661 = vrot.lane.b32.xlu0 %v2064_v19, %s2183_s5  ;;  %s1838_s5 = sshll.u32 %s2313_s12, 5 }
 0x12a   : > { %s216_s20 = scalar_lea.vmem [#allocation5], %s1838_s5 }
 0x12b   : > { %s1758_s7 = sshll.u32 %s216_s20, 4  ;;  %s2610_s7 = int_to_ptr.vmem [resolvable:$true] %s1758_s7 }
 0x12c   : > { %s2095_s28 = scalar_lea.vmem %s2610_s7, 512  ;;  %p2102_p8 = scmp.lt.s32.totalorder %s2610_s7, %s2100_s29 }
 0x12d   : > { %275 = vperm.xlu1 %2045, %v272_v23   ;;  %p2096_p6 = scmp.ne.s32.totalorder %s2610_s7, %s2095_s28  ;;  %p2103_p10 = scmp.lt.s32.totalorder %s2101_s30, %s2095_s28 }
 0x12f   : > { %p2097_p12 = pnand %p2096_p6, %p2670_p11  ;;  %p2104_p0 = por %p2103_p10, %p2102_p8 }
 0x131   : > { %p2098_p13 = pneg %p2097_p12 }
 0x133   : > { %p2105_p2 = pnand %p2104_p0, %p2098_p13 }
 0x13b   : > { %v571_v28 = vpop.permute.xlu1 %570  ;;  %v1297_v29 = vpop.permute.xlu0 %1296 }
 0x13f   : > { %v1213_v30 = vpop.permute.xlu1 %1212  ;;  %v480_v33 = vpop.permute.xlu0 %479 }
 0x143   : > { %v575_v35 = vpop.permute.xlu1 %574  ;;  %v573_v36 = vpop.permute.xlu0 %572 }
 0x144   : > { %v577_v47 = vsel %vm576_vm9, %v571_v28, %v573_v36  ;;  %v578_v48 = vsel %vm576_vm9, %v573_v36, %v575_v35 }
 0x145   : > { %v583_v54 = vsel %vm305_vm0, %v577_v47, 0 }
 0x147   : > { %v1299_v37 = vpop.permute.xlu1 %1298  ;;  %v1301_v38 = vpop.permute.xlu0 %1300 }
 0x148   : > { %v1302_v56 = vsel %vm576_vm9, %v1297_v29, %v1299_v37  ;;  %v1303_v57 = vsel %vm576_vm9, %v1299_v37, %v1301_v38 }
 0x149   : > { %v1308_v61 = vsel %vm305_vm0, %v1302_v56, 0 }
 0x14b   : > { %v482_v39 = vpop.permute.xlu1 %481  ;;  %v484_v40 = vpop.permute.xlu0 %483 }
 0x14c   : > { %v486_v42 = vsel %vm485_vm8, %v480_v33, %v482_v39  ;;  %v487_v43 = vsel %vm485_vm8, %v482_v39, %v484_v40 }
 0x14d   : > { %v492_v44 = vsel %vm305_vm0, %v486_v42, 0  ;;  %1846 = vmatprep.subr.msk.bf16.mxu0 %vm305_vm0, %v487_v43 }
 0x14e   : > { %498 = vmatpush1.bf16.msra.mxu0 %v492_v44 }
 0x14f   : > { %v1217_v49 = vpop.permute.xlu1 %1216  ;;  %v1215_v51 = vpop.permute.xlu0 %1214  ;;  %1849 = vmatprep.subr.msk.bf16.mxu0 %vm305_vm0, %v578_v48 }
 0x150   : > { %v1218_v52 = vsel %vm485_vm8, %v1213_v30, %v1215_v51  ;;  %v1219_v53 = vsel %vm485_vm8, %v1215_v51, %v1217_v49 }
 0x151   : > { %v1224_v55 = vsel %vm305_vm0, %v1218_v52, 0  ;;  %1847 = vmatmul.mubr.msk.bf16.vlgmr.msra.gmra.mrb[0].mxu0 %vm301_vm1, %v461_v17  ;;  %1873 = vmatprep.subr.msk.bf16.mxu1 %vm305_vm0, %v1219_v53 }
 0x152   : > { %589 = vmatpush1.bf16.msra.mxu0 %v583_v54  ;;  %1230 = vmatpush1.bf16.msra.mxu1 %v1224_v55 }
 0x153   : > { %v642_v58 = vpop.permute.xlu1 %641  ;;  %v1363_v59 = vpop.permute.xlu0 %1362  ;;  %1876 = vmatprep.subr.msk.bf16.mxu1 %vm305_vm0, %v1303_v57  ;;  %620 = vmatprep.mubr.bf16.mxu0 %v2172_v45 }
 0x154   : > { %v645_v60 = vsel %vm643_vm10, %v640_v26, %v642_v58 }
 0x155   : > { %1852 = vmatprep.subr.msk.bf16.mxu0 %vm305_vm0, %v645_v60  ;;  %1874 = vmatmul.mubr.msk.bf16.vlgmr.msra.gmra.mrb[0].mxu1 %vm301_vm1, %v1194_v21 }
 0x156   : > { %1314 = vmatpush1.bf16.msra.mxu1 %v1308_v61  ;;  %1345 = vmatprep.mubr.bf16.mxu1 %v2172_v45 }
 0x157   : > { %v1365_v62 = vpop.permute.xlu1 %1364  ;;  %v1367_v63 = vpop.permute.xlu0 %1366 }
 0x158   : > { %v1369_v0 = vsel %vm643_vm10, %v1365_v62, %v1367_v63  ;;  %v1368_v5 = vsel %vm643_vm10, %v1363_v59, %v1365_v62 }
 0x159   : > { %1879 = vmatprep.subr.msk.bf16.mxu1 %vm305_vm0, %v1369_v0  ;;  %v1374_v8 = vsel %vm305_vm0, %v1368_v5, 0 }
 0x15b   : > { %v636_v2 = vpop.permute.xlu1 %635  ;;  %v1361_v3 = vpop.permute.xlu0 %1360 }
 0x15d   : > { %1850 = vmatmul.mubr.msk.bf16.vlgmr.msra.gmra.mrb[0].mxu0 %vm301_vm1, %v552_v22 }
 0x15e   : > { %656 = vmatpush1.bf16.msra.mxu0 %v650_v4  ;;  %687 = vmatprep.mubr.bf16.mxu0 %v2172_v45 }
 0x15f   : > { %v729_v6 = vpop.permute.xlu1 %728  ;;  %v1447_v7 = vpop.permute.xlu0 %1446 }
 0x161   : > { %1877 = vmatmul.mubr.msk.bf16.vlgmr.msra.gmra.mrb[0].mxu1 %vm301_vm1, %v1278_v24 }
 0x162   : > { %1380 = vmatpush1.bf16.msra.mxu1 %v1374_v8  ;;  %1411 = vmatprep.mubr.bf16.mxu1 %v2172_v45 }
 0x163   : > { %v710_v9 = vpop.permute.xlu1 %709  ;;  %v1428_v10 = vpop.permute.xlu0 %1427 }
 0x167   : > { %v820_v11 = vpop.permute.xlu1 %819  ;;  %v822_v12 = vpop.permute.xlu0 %821 }
 0x168   : > { %v826_v14 = vsel %vm825_vm12, %v820_v11, %v822_v12 }
 0x169   : > { %1853 = vmatmul.mubr.msk.bf16.vlgmr.msra.gmra.mrb[0].mxu0 %vm301_vm1, %v636_v2  ;;  %v832_v18 = vsel %vm305_vm0, %v826_v14, 0 }
 0x16a   : > { %778 = vmatprep.mubr.bf16.mxu0 %v2172_v45 }
 0x16b   : > { %v824_v13 = vpop.permute.xlu1 %823  ;;  %v1531_v27 = vpop.permute.xlu0 %1530 }
 0x16c   : > { %v827_v15 = vsel %vm825_vm12, %v822_v12, %v824_v13 }
 0x16d   : > { %1880 = vmatmul.mubr.msk.bf16.vlgmr.msra.gmra.mrb[0].mxu1 %vm301_vm1, %v1361_v3 }
 0x16e   : > { %1495 = vmatprep.mubr.bf16.mxu1 %v2172_v45 }
 0x16f   : > { %v733_v31 = vpop.permute.xlu1 %732  ;;  %v731_v34 = vpop.permute.xlu0 %730 }
 0x170   : > { %v735_v46 = vsel %vm734_vm11, %v729_v6, %v731_v34  ;;  %v736_v41 = vsel %vm734_vm11, %v731_v34, %v733_v31 }
 0x171   : > { %v741_v50 = vsel %vm305_vm0, %v735_v46, 0  ;;  %1855 = vmatprep.subr.msk.bf16.mxu0 %vm305_vm0, %v736_v41 }
 0x172   : > { %747 = vmatpush1.bf16.msra.mxu0 %v741_v50 }
 0x173   : > { %v1449_v16 = vpop.permute.xlu1 %1448  ;;  %v1451_v20 = vpop.permute.xlu0 %1450  ;;  %1858 = vmatprep.subr.msk.bf16.mxu0 %vm305_vm0, %v827_v15 }
 0x174   : > { %v1452_v32 = vsel %vm734_vm11, %v1447_v7, %v1449_v16  ;;  %v1453_v17 = vsel %vm734_vm11, %v1449_v16, %v1451_v20 }
 0x175   : > { %v1458_v19 = vsel %vm305_vm0, %v1452_v32, 0  ;;  %1856 = vmatmul.mubr.msk.bf16.vlgmr.msra.gmra.mrb[0].mxu0 %vm301_vm1, %v710_v9  ;;  %1882 = vmatprep.subr.msk.bf16.mxu1 %vm305_vm0, %v1453_v17 }
 0x176   : > { %838 = vmatpush1.bf16.msra.mxu0 %v832_v18  ;;  %1464 = vmatpush1.bf16.msra.mxu1 %v1458_v19 }
 0x177   : > { %v1533_v21 = vpop.permute.xlu1 %1532  ;;  %v1535_v23 = vpop.permute.xlu0 %1534  ;;  %869 = vmatprep.mubr.bf16.mxu0 %v2172_v45 }
 0x178   : > { %v1536_v22 = vsel %vm825_vm12, %v1531_v27, %v1533_v21  ;;  %v1537_v24 = vsel %vm825_vm12, %v1533_v21, %v1535_v23 }
 0x179   : > { %v1542_v25 = vsel %vm305_vm0, %v1536_v22, 0  ;;  %1883 = vmatmul.mubr.msk.bf16.vlgmr.msra.gmra.mrb[0].mxu1 %vm301_vm1, %v1428_v10  ;;  %1885 = vmatprep.subr.msk.bf16.mxu1 %vm305_vm0, %v1537_v24 }
 0x17a   : > { %1548 = vmatpush1.bf16.msra.mxu1 %v1542_v25  ;;  %1579 = vmatprep.mubr.bf16.mxu1 %v2172_v45 }
 0x17b   : > { %v801_v26 = vpop.permute.xlu1 %800  ;;  %v1512_v28 = vpop.permute.xlu0 %1511 }
 0x17f   : > { %v887_v29 = vpop.permute.xlu1 %886  ;;  %v889_v30 = vpop.permute.xlu0 %888 }
 0x180   : > { %v893_v33 = vsel %vm892_vm13, %v887_v29, %v889_v30 }
 0x181   : > { %1859 = vmatmul.mubr.msk.bf16.vlgmr.msra.gmra.mrb[0].mxu0 %vm301_vm1, %v801_v26  ;;  %v899_v38 = vsel %vm305_vm0, %v893_v33, 0 }
 0x182   : > { %936 = vmatprep.mubr.bf16.mxu0 %v2172_v45 }
 0x183   : > { %v891_v35 = vpop.permute.xlu1 %890  ;;  %v1597_v36 = vpop.permute.xlu0 %1596 }
 0x184   : > { %v894_v37 = vsel %vm892_vm13, %v889_v30, %v891_v35 }
 0x185   : > { %1861 = vmatprep.subr.msk.bf16.mxu0 %vm305_vm0, %v894_v37  ;;  %1886 = vmatmul.mubr.msk.bf16.vlgmr.msra.gmra.mrb[0].mxu1 %vm301_vm1, %v1512_v28 }
 0x186   : > { %905 = vmatpush1.bf16.msra.mxu0 %v899_v38  ;;  %1645 = vmatprep.mubr.bf16.mxu1 %v2172_v45 }
 0x187   : > { %v1599_v39 = vpop.permute.xlu1 %1598  ;;  %v1601_v40 = vpop.permute.xlu0 %1600 }
 0x188   : > { %v1602_v42 = vsel %vm892_vm13, %v1597_v36, %v1599_v39  ;;  %v1603_v43 = vsel %vm892_vm13, %v1599_v39, %v1601_v40 }
 0x189   : > { %v1608_v44 = vsel %vm305_vm0, %v1602_v42, 0  ;;  %1888 = vmatprep.subr.msk.bf16.mxu1 %vm305_vm0, %v1603_v43 }
 0x18a   : > { %1614 = vmatpush1.bf16.msra.mxu1 %v1608_v44 }
 0x18b   : > { %v885_v47 = vpop.permute.xlu1 %884  ;;  %v1595_v48 = vpop.permute.xlu0 %1594 }
 0x18d   : > { %1862 = vmatmul.mubr.msk.bf16.vlgmr.msra.gmra.mrb[0].mxu0 %vm301_vm1, %v885_v47 }
 0x18e   : > { %1027 = vmatprep.mubr.bf16.mxu0 %v2172_v45 }
 0x18f   : > { %v978_v49 = vpop.permute.xlu1 %977  ;;  %v1681_v51 = vpop.permute.xlu0 %1680 }
 0x191   : > { %1889 = vmatmul.mubr.msk.bf16.vlgmr.msra.gmra.mrb[0].mxu1 %vm301_vm1, %v1595_v48 }
 0x192   : > { %1729 = vmatprep.mubr.bf16.mxu1 %v2172_v45 }
 0x193   : > { %v982_v52 = vpop.permute.xlu1 %981  ;;  %v980_v53 = vpop.permute.xlu0 %979 }
 0x194   : > { %v984_v54 = vsel %vm983_vm14, %v978_v49, %v980_v53  ;;  %v985_v55 = vsel %vm983_vm14, %v980_v53, %v982_v52 }
 0x195   : > { %v990_v56 = vsel %vm305_vm0, %v984_v54, 0  ;;  %1864 = vmatprep.subr.msk.bf16.mxu0 %vm305_vm0, %v985_v55 }
 0x196   : > { %996 = vmatpush1.bf16.msra.mxu0 %v990_v56 }
 0x197   : > { %v1683_v57 = vpop.permute.xlu1 %1682  ;;  %v1685_v58 = vpop.permute.xlu0 %1684 }
 0x198   : > { %v1686_v59 = vsel %vm983_vm14, %v1681_v51, %v1683_v57  ;;  %v1687_v60 = vsel %vm983_vm14, %v1683_v57, %v1685_v58 }
 0x199   : > { %v1692_v61 = vsel %vm305_vm0, %v1686_v59, 0  ;;  %1891 = vmatprep.subr.msk.bf16.mxu1 %vm305_vm0, %v1687_v60 }
 0x19a   : > { %1698 = vmatpush1.bf16.msra.mxu1 %v1692_v61 }
 0x19b   : > { %v959_v45 = vpop.permute.xlu1 %958  ;;  %v1662_v62 = vpop.permute.xlu0 %1661 }
 0x19c   : > { %1865 = vmatmul.mubr.msk.bf16.vlgmr.msra.gmra.mrb[0].mxu0 %vm301_vm1, %v959_v45 }
 0x19d   : > { %1892 = vmatmul.mubr.msk.bf16.vlgmr.msra.gmra.mrb[0].mxu1 %vm301_vm1, %v1662_v62 }
 0x1ac   : > { %v276_v63 = vpop.permute.xlu1 %275 }
 0x26f   : > { %v1029_v0 = vpop.f32.mrb[0].mxu0 }
 0x270   : > { %v1903_v1 = vadd.f32 %v1029_v0, %v276_v63  ;;  %v1031_v2 = vpop.f32.mrb[1].mxu0  ;;  %v1731_v3 = vpop.f32.mrb[0].mxu1 }
 0x271   : > { %v1904_v4 = vadd.f32 %v1031_v2, %v276_v63  ;;  %v1905_v5 = vadd.f32 %v1731_v3, %v276_v63  ;;  %v1033_v6 = vpop.f32.mrb[2].mxu0  ;;  %v1733_v7 = vpop.f32.mrb[1].mxu1 }
 0x272   : > { %1038 = vst [vmem:[%s216_s20] sm:$0xff] %v1903_v1  ;;  %v1906_v8 = vadd.f32 %v1733_v7, %v276_v63  ;;  %v1034_v9 = vpop.f32.mrb[3].mxu0  ;;  %v1735_v10 = vpop.f32.mrb[2].mxu1 }
 0x273   : > { %1039 = vst [vmem:[%s216_s20 + $0x8] sm:$0xff] %v1904_v4  ;;  %1893 = vst [vmem:[%s216_s20 + $0x10] sm:$0xff] %v1905_v5  ;;  %v1736_v11 = vpop.f32.mrb[3].mxu1 }
 0x274   : > { %1894 = vst [vmem:[%s216_s20 + $0x18] sm:$0xff] %v1906_v8 }
 0x275   : > { %2108 = shalt.err (!%p2105_p2)
}
 0x276   : > { %s2109_s6 = scalar_lea.hbm %s2615_s10, 512  ;;  %s2113_s14 = scalar_lea.hbm %s2664_s4, 1024 }
 0x277   : > { %p2110_p4 = scmp.ne.s32.totalorder %s2615_s10, %s2109_s6  ;;  %p2114_p9 = scmp.lt.u32.totalorder %s2615_s10, %s2664_s4 }
 0x278   : > { %p2115_p1 = scmp.lt.u32.totalorder %s2113_s14, %s2109_s6  ;;  %p2117_p6 = scmp.lt.u32.totalorder %s2109_s6, %s2615_s10 }
 0x279   : > { %p2111_p5 = pnand %p2110_p4, %p2670_p11 }
 0x27a   : > { %p2116_p3 = por %p2115_p1, %p2114_p9 }
 0x27b   : > { %p2112_p7 = pneg %p2111_p5 }
 0x27c   : > { %p2118_p12 = por %p2117_p6, %p2116_p3 }
 0x27e   : > { %p2119_p13 = pnand %p2118_p12, %p2112_p7 }
 0x280   : > { %2122 = shalt.err (!%p2119_p13)
}
 0x281   : > { %s2189_s8 = smov 256  }
 0x282   : > { %1976 = dma.vmem_to_hbm [thread:$0]  (%p2670_p11), %s2610_s7, 512, %s2615_s10, %s1744_s23, %s2189_s8, %s2189_s8, %s2171_s22  }
 0x283 PF: > { %s1773_s25 = sand.u32 1, %s2149_s15   ;;  %p2671_p8 = scmp.ne.s32.totalorder %s2668_s27, 0 }
 0x284   : > { %p2672_p10 = scmp.ge.s32.totalorder %s2161_s18, 2  ;;  %s1774_s19 = scalar_lea.sflag [#allocation4], %s1773_s25 }
 0x286   : > { %p1983_p0 = pnand %p2672_p10, %p2671_p8 }
 0x288   : > { %2144 = dma.done.wait (!%p1983_p0), %s1774_s19, 512  }
 0x289   : > { %2146 = vsyncadd (!%p1983_p0), %s1774_s19, 4294966784  ;;  %p17_p2 = scmp.ge.s32.totalorder %s2240_s21, 4   ;;  %s2673_s15 = smov %s2153_s16 }
 0x28a   : > { %s2674_s16 = smov %s2157_s17  ;;  %s2675_s17 = smov %s2252_s24 }
 0x28b   : > { %s2676_s18 = smov %s2240_s21  ;;  %19 = sbr.rel (!%p17_p2) target bundleno = 5 (0x5), region = 83 }
 0x292   :  { %1779 = vsyncpa [#allocation3], 1 }
 0x293   :  { %1781 = vsyncpa [#allocation3 + $0x1], 1 }
 0x294   :  { %1782 = vsyncpa [#allocation4], 1 }
 0x295   :  { %1784 = vsyncpa [#allocation4 + $0x1], 1 }

</bundles_post_ra>
